<compile_context>
chip_gen: v5e
topology: v5e:2x2
jax: 0.10.0
libtpu: 0.0.40
codegen_flags: <defaults>
</compile_context>

<pallas_src>
from functools import lru_cache, partial

import numpy as np
import jax
import jax.numpy as jnp
from jax.experimental import pallas as pl
from jax.experimental.pallas import tpu as pltpu


# --------------------------------------------------------------------------- #
# host-side helpers
# --------------------------------------------------------------------------- #
@lru_cache(maxsize=None)
def _bilinear_matrix(in_size: int, scale: int) -> np.ndarray:
    """1-D bilinear interpolation matrix matching PyTorch align_corners=False."""
    out_size = in_size * scale
    i = np.arange(out_size, dtype=np.float64)
    src = (i + 0.5) / scale - 0.5
    src = np.maximum(src, 0.0)                       # PyTorch clamps negative src
    i0 = np.minimum(np.floor(src).astype(np.int64), in_size - 1)
    lam = src - i0
    i1 = np.minimum(i0 + 1, in_size - 1)
    m = np.zeros((out_size, in_size), dtype=np.float32)
    rows = np.arange(out_size)
    m[rows, i0] += (1.0 - lam).astype(np.float32)
    m[rows, i1] += lam.astype(np.float32)
    return m


def _padded_f32_bytes(rows: int, cols: int) -> int:
    """Bytes of an f32 (rows, cols) VMEM tile after (8,128) tiling/padding."""
    return 4 * (-(-rows // 8) * 8) * (-(-cols // 128) * 128)


def _choose_block_n(N, Ci, H, W, Co, Ho, Wo, target_bytes=1 << 20) -> int:
    """Batch elements per grid step.

    Grow the block until per-step input+output tiles reach ~target_bytes
    (amortizes per-step overhead on single-TC v5e/v6e), but keep the grid
    length >= 2 when possible so both v7x TensorCores get work.
    """
    if N <= 1:
        return 1
    # With BN < N the block's second-minor dims must stay 8-aligned.
    if (Ci * H) % 8 or (Co * Ho) % 8:
        return N
    per_elem = _padded_f32_bytes(Ci * H, W) + _padded_f32_bytes(Co * Ho, Wo)
    bn = int(max(1, min(N, target_bytes // max(per_elem, 1))))
    while N % bn:
        bn -= 1
    if N // bn < 2:                       # keep >=2 grid steps for the 2 v7x TCs
        bn = max(1, N // 2)
        while N % bn:
            bn -= 1
    return bn


# --------------------------------------------------------------------------- #
# kernel
# --------------------------------------------------------------------------- #
def upsample_kernel(x_ref, act_ref, k_ref, o_ref, *, bn, ci_h, co_ho):
    # x_ref:   (BN*Ci*H, W)      BN batch elements, flattened (c,h) rows
    # act_ref: (W, Wo)           width-resize matrix, transposed
    # k_ref:   (Co*Ho, Ci*H)     kron(conv1x1 weight, height-resize matrix)
    # o_ref:   (BN*Co*Ho, Wo)    output block
    #
    # Width pass: one 2-D MXU matmul with the batch folded into M.
    z = jnp.dot(x_ref[...], act_ref[...],
                preferred_element_type=jnp.float32)           # (BN*Ci*H, Wo)
    k = k_ref[...]
    # Height + 1x1-conv pass (fused in K): one full-size MXU matmul per batch
    # element in the block (contraction depth Ci*H), stored as one slab each.
    for n in range(bn):                                        # small static unroll
        if bn > 1:
            zn = z[n * ci_h:(n + 1) * ci_h, :]
            on = jnp.dot(k, zn, preferred_element_type=jnp.float32)
            o_ref[n * co_ho:(n + 1) * co_ho, :] = on.astype(o_ref.dtype)
        else:
            on = jnp.dot(k, z, preferred_element_type=jnp.float32)
            o_ref[...] = on.astype(o_ref.dtype)


# --------------------------------------------------------------------------- #
# wrapper
# --------------------------------------------------------------------------- #
def upsample_pallas(x_nchw, w_pt, scale_factor: int = 2, use_bf16: bool = False):
    """x_nchw: (N, Cin, H, W) float32; w_pt: (Cout, Cin, 1, 1) float32 -> NCHW out."""
    N, Ci, H, W = x_nchw.shape
    Co = w_pt.shape[0]
    Ho, Wo = H * scale_factor, W * scale_factor

    # Operands (tiny): width matrix transposed, and the conv-fused height matrix.
    act = jnp.asarray(_bilinear_matrix(W, scale_factor).T)        # (W, Wo)
    ar = jnp.asarray(_bilinear_matrix(H, scale_factor))           # (Ho, H)
    w_mat = w_pt[:, :, 0, 0]                                      # (Co, Ci)
    k_mat = jnp.kron(w_mat, ar)                                   # (Co*Ho, Ci*H)

    # Pure-metadata reshape: (N, Ci, H, W) -> (N*Ci*H, W).
    x_flat = x_nchw.reshape(N * Ci * H, W)

    if use_bf16:   # bf16 operands, f32 MXU accumulation (v6e/v7x bandwidth win)
        x_flat = x_flat.astype(jnp.bfloat16)
        act = act.astype(jnp.bfloat16)
        k_mat = k_mat.astype(jnp.bfloat16)

    bn = _choose_block_n(N, Ci, H, W, Co, Ho, Wo)
    grid = (N // bn,)

    # VMEM budget from (8,128)-padded tiles (double-buffered ins/outs + intermediate),
    # clamped to the actual chip capacity (64 MiB on v7x, 128 MiB on v5e/v6e).
    per_step = (2 * _padded_f32_bytes(bn * Ci * H, W)
                + 2 * _padded_f32_bytes(bn * Co * Ho, Wo)
                + 2 * _padded_f32_bytes(W, Wo)
                + 2 * _padded_f32_bytes(Co * Ho, Ci * H)
                + _padded_f32_bytes(bn * Ci * H, Wo))
    try:
        vmem_cap = int(pltpu.get_tpu_info().vmem_capacity_bytes)
    except Exception:
        vmem_cap = 64 * 1024 * 1024
    vmem_limit = int(min(max(2 * per_step, 16 << 20), (vmem_cap * 3) // 4))

    kernel = partial(upsample_kernel, bn=bn, ci_h=Ci * H, co_ho=Co * Ho)

    out_flat = pl.pallas_call(
        kernel,
        out_shape=jax.ShapeDtypeStruct((N * Co * Ho, Wo), x_nchw.dtype),
        grid=grid,
        in_specs=[
            pl.BlockSpec((bn * Ci * H, W), lambda i: (i, 0)),     # x batch tile
            pl.BlockSpec((W, Wo), lambda i: (0, 0)),              # width matrix^T
            pl.BlockSpec((Co * Ho, Ci * H), lambda i: (0, 0)),    # kron(conv, Ar)
        ],
        out_specs=pl.BlockSpec((bn * Co * Ho, Wo), lambda i: (i, 0)),
        compiler_params=pltpu.CompilerParams(
            dimension_semantics=("parallel",),
            vmem_limit_bytes=vmem_limit,
        ),
    )(x_flat, act, k_mat)

    # Pure-metadata reshape back to NCHW (row-major identical, no transpose).
    return out_flat.reshape(N, Co, Ho, Wo)


# --------------------------------------------------------------------------- #
# pure-JAX reference (PyTorch module order and bilinear semantics)
# --------------------------------------------------------------------------- #
def reference(x_nchw, w_pt, scale_factor: int = 2):
    y = jnp.einsum("nchw,oc->nohw", x_nchw, w_pt[:, :, 0, 0])   # conv1x1, no bias
    _, _, H, W = y.shape

    def idx_lam(in_size, scale):
        i = np.arange(in_size * scale, dtype=np.float64)
        src = np.maximum((i + 0.5) / scale - 0.5, 0.0)
        i0 = np.minimum(np.floor(src).astype(np.int64), in_size - 1)
        lam = (src - i0).astype(np.float32)
        i1 = np.minimum(i0 + 1, in_size - 1)
        return i0, i1, lam

    r0, r1, lr = idx_lam(H, scale_factor)
    c0, c1, lc = idx_lam(W, scale_factor)
    lr = jnp.asarray(lr)[None, None, :, None]
    lc = jnp.asarray(lc)[None, None, None, :]
    rows = (1.0 - lr) * y[:, :, r0, :] + lr * y[:, :, r1, :]
    out = (1.0 - lc) * rows[:, :, :, c0] + lc * rows[:, :, :, c1]
    return out


if __name__ == "__main__":
    key = jax.random.PRNGKey(0)
    k_x, k_w = jax.random.split(key)

    N, Ci, Co, H, W = 2, 4, 8, 16, 16
    scale = 2

    x = jax.random.normal(k_x, (N, Ci, H, W), dtype=jnp.float32)
    # conv1x1 weight, PyTorch layout (out_ch, in_ch, 1, 1)
    w = jax.random.normal(k_w, (Co, Ci, 1, 1), dtype=jnp.float32) * (1.0 / np.sqrt(Ci))

    out = upsample_pallas(x, w, scale_factor=scale)
    out = jax.block_until_ready(out)

    ref = reference(x, w, scale_factor=scale)
    assert out.shape == (N, Co, H * scale, W * scale), out.shape
    assert out.dtype == jnp.float32
    max_err = float(jnp.max(jnp.abs(out - ref)))
    assert max_err < 1e-4, f"max abs error {max_err}"

    print("KERNEL_OK")
</pallas_src>

<mosaic_0001>
module attributes {stable_mosaic.version = 11 : i64} {
  func.func @upsample_kernel(%arg0: i32, %arg1: memref<64x16xf32, #tpu.memory_space<vmem>>, %arg2: memref<16x32xf32, #tpu.memory_space<vmem>>, %arg3: memref<256x64xf32, #tpu.memory_space<vmem>>, %arg4: memref<256x32xf32, #tpu.memory_space<vmem>>) attributes {dimension_semantics = [#tpu.dimension_semantics<parallel>], iteration_bounds = array<i64: 2>, scalar_prefetch = 0 : i64, scratch_operands = 0 : i64, tpu.core_type = #tpu.core_type<tc>, window_params = [{transform_indices = @transform_0, window_bounds = array<i64: 64, 16>}, {pipeline_mode = #tpu.pipeline_mode<synchronous>, transform_indices = @transform_1, window_bounds = array<i64: 16, 32>}, {pipeline_mode = #tpu.pipeline_mode<synchronous>, transform_indices = @transform_2, window_bounds = array<i64: 256, 64>}, {transform_indices = @transform_3, window_bounds = array<i64: 256, 32>}]} {
    %c0 = arith.constant 0 : index
    %c0_0 = arith.constant 0 : index
    %0 = vector.load %arg1[%c0, %c0_0] : memref<64x16xf32, #tpu.memory_space<vmem>>, vector<64x16xf32>
    %c0_1 = arith.constant 0 : index
    %c0_2 = arith.constant 0 : index
    %1 = vector.load %arg2[%c0_1, %c0_2] : memref<16x32xf32, #tpu.memory_space<vmem>>, vector<16x32xf32>
    %cst = arith.constant dense<0.000000e+00> : vector<64x32xf32>
    %2 = tpu.matmul %0, %1, %cst {dimension_numbers = #tpu.dot_dimension_numbers<[1], [0], [0], [1], [0, 0, 1, 1], [], []>} : vector<64x16xf32>, vector<16x32xf32>, vector<64x32xf32> -> vector<64x32xf32>
    %c0_3 = arith.constant 0 : index
    %c0_4 = arith.constant 0 : index
    %3 = vector.load %arg3[%c0_3, %c0_4] : memref<256x64xf32, #tpu.memory_space<vmem>>, vector<256x64xf32>
    %cst_5 = arith.constant dense<0.000000e+00> : vector<256x32xf32>
    %4 = tpu.matmul %3, %2, %cst_5 {dimension_numbers = #tpu.dot_dimension_numbers<[1], [0], [0], [1], [0, 0, 1, 1], [], []>} : vector<256x64xf32>, vector<64x32xf32>, vector<256x32xf32> -> vector<256x32xf32>
    %c0_6 = arith.constant 0 : index
    %c0_7 = arith.constant 0 : index
    %5 = vector.load %arg4[%c0_6, %c0_7] : memref<256x32xf32, #tpu.memory_space<vmem>>, vector<256x32xf32>
    tpu.vector_store %arg4[%c0_6, %c0_7], %4 {strides = array<i32>} : memref<256x32xf32, #tpu.memory_space<vmem>>, vector<256x32xf32>,
    return
  }
  func.func @transform_0(%arg0: i32) -> (i32, i32) {
    %c0_i32 = arith.constant 0 : i32
    %c0_i32_0 = arith.constant 0 : i32
    return %arg0, %c0_i32 : i32, i32
  }
  func.func @transform_1(%arg0: i32) -> (i32, i32) {
    %c0_i32 = arith.constant 0 : i32
    %c0_i32_0 = arith.constant 0 : i32
    %c0_i32_1 = arith.constant 0 : i32
    return %c0_i32, %c0_i32_0 : i32, i32
  }
  func.func @transform_2(%arg0: i32) -> (i32, i32) {
    %c0_i32 = arith.constant 0 : i32
    %c0_i32_0 = arith.constant 0 : i32
    %c0_i32_1 = arith.constant 0 : i32
    return %c0_i32, %c0_i32_0 : i32, i32
  }
  func.func @transform_3(%arg0: i32) -> (i32, i32) {
    %c0_i32 = arith.constant 0 : i32
    %c0_i32_0 = arith.constant 0 : i32
    return %arg0, %c0_i32 : i32, i32
  }
}

</mosaic_0001>

<bundles_post_ra>
// kernel: tpu_custom_call.1
= control target key start
LH: loop header
LB: loop body
LE: loop exit
PB: predicated region body
PF: predicated region fallthrough
CT: control target
= control target key end

     0   :  { %s692_s12 = smov 0   ;;  %s921_s0 = inlined_call_operand.vmem [shape: f32[128,16], index: 0, kind: input, shape index: {}]   ;;  %s922_s1 = inlined_call_operand.vmem [shape: f32[16,32], index: 1, kind: input, shape index: {}]   ;;  %s923_s2 = inlined_call_operand.vmem [shape: f32[256,64], index: 2, kind: input, shape index: {}]   ;;  %s924_s3 = inlined_call_operand.vmem [shape: f32[512,32], index: 3, kind: output, shape index: {}]  }
   0x1 LB: > { %s581_s13 = sadd.s32 4294967295, %s670_s12   ;;  %p585_p0 = scmp.ge.s32.totalorder %s670_s12, 1  ;;  %s670_s12 = sphi %s692_s12, %s13_s12  }
   0x2   : > { %p138_p1 = scmp.lt.s32.totalorder %s670_s12, 3 }
   0x4   : > { %p139_p2 = pnand %p585_p0, %p138_p1 }
   0x5   : > { %s586_s18 = sshll.u32 (!%p139_p2), %s581_s13, 3  ;;  %s588_s10 = sshll.u32 (!%p139_p2), %s581_s13, 5 }
   0x6   : > { %142 = sbr.rel (%p139_p2) target bundleno = 419 (0x1a3), region = 32  ;;  %p163_p3 = scmp.lt.s32.totalorder (!%p139_p2), %s586_s18, 15 }
   0x7   : > { %p169_p4 = scmp.lt.s32.totalorder (!%p139_p2), %s588_s10, 63 }
   0xb   : > { %v183_v0 = vld [vmem:[%s922_s1 + $0x8] sm:$0xff]  ;;  %v182_v1 = vld [vmem:[%s922_s1] sm:$0xff]  ;;  %s926_s18 = smov (!%p163_p3, %s586_s18), 15  ;;  %vm184_vm0 = vcmask 130048   ;;  %vm282_vm1 = vcmask 523264   ;;  %v272_v19 = vld [vmem:[%s923_s2 + $0xb0] sm:$0xff] }
   0xc   : > { %223 = vmatpush.msra.mxu0 %v183_v0  ;;  %s587_s19 = sshll.u32 %s926_s18, 3  ;;  %v262_v18 = vld [vmem:[%s923_s2 + $0x60] sm:$0xff]  ;;  %v252_v20 = vld [vmem:[%s923_s2 + $0x10] sm:$0xff]  ;;  %v263_v21 = vld [vmem:[%s923_s2 + $0x68] sm:$0xff]  ;;  %s928_s10 = smov (!%p169_p4, %s588_s10), 63  ;;  %vm492_vm2 = vcmask 261120  }
   0xd   : > { %s166_s22 = scalar_lea.vmem %s921_s0, %s587_s19  ;;  %v273_v22 = vld [vmem:[%s923_s2 + $0xb8] sm:$0xff]  ;;  %v264_v24 = vld [vmem:[%s923_s2 + $0x70] sm:$0xff]  ;;  %v274_v25 = vld [vmem:[%s923_s2 + $0xc0] sm:$0xff]  ;;  %s589_s11 = sshll.u32 %s928_s10, 3 }
   0xe   : > { %224 = vmatpush.msra.mxu0 %v182_v1  ;;  %v174_v2 = vld [vmem:[%s166_s22] sm:$0xff]  ;;  %v175_v3 = vld [vmem:[%s166_s22 + $0x8] sm:$0xff]  ;;  %v176_v4 = vld [vmem:[%s166_s22 + $0x10] sm:$0xff]  ;;  %s852_s16 = scalar_lea.vmem %s924_s3, %s589_s11 }
   0xf   : > { %590 = vmatmul.msk.f32.vlgmr.msra.gmra.mxu0 %vm184_vm0, %v174_v2  ;;  %v177_v5 = vld [vmem:[%s166_s22 + $0x18] sm:$0xff]  ;;  %v178_v6 = vld [vmem:[%s166_s22 + $0x20] sm:$0xff]  ;;  %v179_v7 = vld [vmem:[%s166_s22 + $0x28] sm:$0xff] }
  0x10   : > { %v180_v8 = vld [vmem:[%s166_s22 + $0x30] sm:$0xff]  ;;  %v181_v9 = vld [vmem:[%s166_s22 + $0x38] sm:$0xff]  ;;  %v254_v26 = vld [vmem:[%s923_s2 + $0x20] sm:$0xff] }
  0x11   : > { %v253_v23 = vld [vmem:[%s923_s2 + $0x18] sm:$0xff]  ;;  %v275_v28 = vld [vmem:[%s923_s2 + $0xc8] sm:$0xff]  ;;  %v266_v30 = vld [vmem:[%s923_s2 + $0x80] sm:$0xff] }
  0x12   : > { %v265_v27 = vld [vmem:[%s923_s2 + $0x78] sm:$0xff]  ;;  %v255_v29 = vld [vmem:[%s923_s2 + $0x28] sm:$0xff]  ;;  %v276_v31 = vld [vmem:[%s923_s2 + $0xd0] sm:$0xff] }
  0x13   : > { %v256_v32 = vld [vmem:[%s923_s2 + $0x30] sm:$0xff]  ;;  %v250_v33 = vld [vmem:[%s923_s2] sm:$0xff]  ;;  %v267_v34 = vld [vmem:[%s923_s2 + $0x88] sm:$0xff] }
  0x14   : > { %v277_v35 = vld [vmem:[%s923_s2 + $0xd8] sm:$0xff]  ;;  %v251_v37 = vld [vmem:[%s923_s2 + $0x8] sm:$0xff]  ;;  %v268_v38 = vld [vmem:[%s923_s2 + $0x90] sm:$0xff] }
  0x15   : > { %v257_v36 = vld [vmem:[%s923_s2 + $0x38] sm:$0xff]  ;;  %v278_v39 = vld [vmem:[%s923_s2 + $0xe0] sm:$0xff]  ;;  %v279_v42 = vld [vmem:[%s923_s2 + $0xe8] sm:$0xff] }
  0x16   : > { %v258_v40 = vld [vmem:[%s923_s2 + $0x40] sm:$0xff]  ;;  %v269_v41 = vld [vmem:[%s923_s2 + $0x98] sm:$0xff]  ;;  %v259_v43 = vld [vmem:[%s923_s2 + $0x48] sm:$0xff] }
  0x17   : > { %591 = vmatmul.msk.f32.gmra.mxu0 %vm184_vm0, %v175_v3  ;;  %v270_v44 = vld [vmem:[%s923_s2 + $0xa0] sm:$0xff]  ;;  %v280_v45 = vld [vmem:[%s923_s2 + $0xf0] sm:$0xff]  ;;  %v271_v47 = vld [vmem:[%s923_s2 + $0xa8] sm:$0xff] }
  0x18   : > { %v260_v46 = vld [vmem:[%s923_s2 + $0x50] sm:$0xff]  ;;  %v281_v48 = vld [vmem:[%s923_s2 + $0xf8] sm:$0xff] }
  0x19   : > { %v261_v49 = vld [vmem:[%s923_s2 + $0x58] sm:$0xff] }
  0x1f   : > { %592 = vmatmul.msk.f32.gmra.mxu0 %vm184_vm0, %v176_v4 }
  0x27   : > { %593 = vmatmul.msk.f32.gmra.mxu0 %vm184_vm0, %v177_v5 }
  0x2f   : > { %594 = vmatmul.msk.f32.gmra.mxu0 %vm184_vm0, %v178_v6 }
  0x37   : > { %595 = vmatmul.msk.f32.gmra.mxu0 %vm184_vm0, %v179_v7 }
  0x3f   : > { %596 = vmatmul.msk.f32.gmra.mxu0 %vm184_vm0, %v180_v8 }
  0x47   : > { %597 = vmatmul.msk.f32.gmra.mxu0 %vm184_vm0, %v181_v9 }
  0x8c   : > { %v226_v10 = vpop.f32.mrf.mxu0 }
  0x94   : > { %v229_v11 = vpop.f32.mrf.mxu0 }
  0x9c   : > { %v232_v12 = vpop.f32.mrf.mxu0 }
  0xa4   : > { %v235_v13 = vpop.f32.mrf.mxu0 }
  0xac   : > { %v238_v14 = vpop.f32.mrf.mxu0 }
  0xb4   : > { %v241_v15 = vpop.f32.mrf.mxu0 }
  0xbc   : > { %v244_v16 = vpop.f32.mrf.mxu0 }
  0xc4   : > { %v247_v17 = vpop.f32.mrf.mxu0 }
  0xc5   : > { %387 = vmatpush.msrb.mxu0 %v247_v17  ;;  %632 = vmatpush.msra.mxu1 %v247_v17 }
  0xc6   : > { %633 = vmatpush.msra.mxu2 %v247_v17  ;;  %634 = vmatpush.msra.mxu3 %v247_v17 }
  0xc7   : > { %388 = vmatpush.msrb.mxu0 %v244_v16  ;;  %635 = vmatpush.msra.mxu1 %v244_v16 }
  0xc8   : > { %636 = vmatpush.msra.mxu2 %v244_v16  ;;  %637 = vmatpush.msra.mxu3 %v244_v16 }
  0xc9   : > { %389 = vmatpush.msrb.mxu0 %v241_v15  ;;  %638 = vmatpush.msra.mxu1 %v241_v15 }
  0xca   : > { %639 = vmatpush.msra.mxu2 %v241_v15  ;;  %640 = vmatpush.msra.mxu3 %v241_v15 }
  0xcb   : > { %390 = vmatpush.msrb.mxu0 %v238_v14  ;;  %641 = vmatpush.msra.mxu1 %v238_v14 }
  0xcc   : > { %642 = vmatpush.msra.mxu2 %v238_v14  ;;  %643 = vmatpush.msra.mxu3 %v238_v14 }
  0xcd   : > { %391 = vmatpush.msrb.mxu0 %v235_v13  ;;  %644 = vmatpush.msra.mxu1 %v235_v13 }
  0xce   : > { %645 = vmatpush.msra.mxu2 %v235_v13  ;;  %646 = vmatpush.msra.mxu3 %v235_v13 }
  0xcf   : > { %392 = vmatpush.msrb.mxu0 %v232_v12  ;;  %647 = vmatpush.msra.mxu1 %v232_v12 }
  0xd0   : > { %648 = vmatpush.msra.mxu2 %v232_v12  ;;  %649 = vmatpush.msra.mxu3 %v232_v12 }
  0xd1   : > { %393 = vmatpush.msrb.mxu0 %v229_v11  ;;  %650 = vmatpush.msra.mxu1 %v229_v11 }
  0xd2   : > { %651 = vmatpush.msra.mxu2 %v229_v11  ;;  %652 = vmatpush.msra.mxu3 %v229_v11 }
  0xd3   : > { %394 = vmatpush.msrb.mxu0 %v226_v10  ;;  %653 = vmatpush.msra.mxu1 %v226_v10 }
  0xd4   : > { %654 = vmatpush.msra.mxu2 %v226_v10  ;;  %655 = vmatpush.msra.mxu3 %v226_v10 }
  0xd5   : > { %610 = vmatmul.msk.f32.vlgmr.msra.gmra.mxu2 %vm282_vm1, %v262_v18  ;;  %620 = vmatmul.msk.f32.vlgmr.msra.gmra.mxu3 %vm282_vm1, %v272_v19 }
  0xd6   : > { %600 = vmatmul.msk.f32.vlgmr.msra.gmra.mxu1 %vm282_vm1, %v252_v20  ;;  %598 = vmatmul.msk.f32.vlgmr.msrb.gmra.mxu0 %vm282_vm1, %v250_v33 }
  0xdd   : > { %611 = vmatmul.msk.f32.gmra.mxu2 %vm282_vm1, %v263_v21  ;;  %621 = vmatmul.msk.f32.gmra.mxu3 %vm282_vm1, %v273_v22 }
  0xde   : > { %601 = vmatmul.msk.f32.gmra.mxu1 %vm282_vm1, %v253_v23  ;;  %599 = vmatmul.msk.f32.gmra.mxu0 %vm282_vm1, %v251_v37 }
  0xe5   : > { %612 = vmatmul.msk.f32.gmra.mxu2 %vm282_vm1, %v264_v24  ;;  %622 = vmatmul.msk.f32.gmra.mxu3 %vm282_vm1, %v274_v25 }
  0xe6   : > { %602 = vmatmul.msk.f32.gmra.mxu1 %vm282_vm1, %v254_v26 }
  0xed   : > { %613 = vmatmul.msk.f32.gmra.mxu2 %vm282_vm1, %v265_v27  ;;  %623 = vmatmul.msk.f32.gmra.mxu3 %vm282_vm1, %v275_v28 }
  0xee   : > { %603 = vmatmul.msk.f32.gmra.mxu1 %vm282_vm1, %v255_v29 }
  0xf5   : > { %614 = vmatmul.msk.f32.gmra.mxu2 %vm282_vm1, %v266_v30  ;;  %624 = vmatmul.msk.f32.gmra.mxu3 %vm282_vm1, %v276_v31 }
  0xf6   : > { %604 = vmatmul.msk.f32.gmra.mxu1 %vm282_vm1, %v256_v32 }
  0xfd   : > { %615 = vmatmul.msk.f32.gmra.mxu2 %vm282_vm1, %v267_v34  ;;  %625 = vmatmul.msk.f32.gmra.mxu3 %vm282_vm1, %v277_v35 }
  0xfe   : > { %605 = vmatmul.msk.f32.gmra.mxu1 %vm282_vm1, %v257_v36 }
 0x105   : > { %616 = vmatmul.msk.f32.gmra.mxu2 %vm282_vm1, %v268_v38  ;;  %626 = vmatmul.msk.f32.gmra.mxu3 %vm282_vm1, %v278_v39 }
 0x106   : > { %606 = vmatmul.msk.f32.gmra.mxu1 %vm282_vm1, %v258_v40 }
 0x10d   : > { %617 = vmatmul.msk.f32.gmra.mxu2 %vm282_vm1, %v269_v41  ;;  %627 = vmatmul.msk.f32.gmra.mxu3 %vm282_vm1, %v279_v42 }
 0x10e   : > { %607 = vmatmul.msk.f32.gmra.mxu1 %vm282_vm1, %v259_v43 }
 0x115   : > { %618 = vmatmul.msk.f32.gmra.mxu2 %vm282_vm1, %v270_v44  ;;  %628 = vmatmul.msk.f32.gmra.mxu3 %vm282_vm1, %v280_v45 }
 0x116   : > { %608 = vmatmul.msk.f32.gmra.mxu1 %vm282_vm1, %v260_v46 }
 0x11d   : > { %619 = vmatmul.msk.f32.gmra.mxu2 %vm282_vm1, %v271_v47  ;;  %629 = vmatmul.msk.f32.gmra.mxu3 %vm282_vm1, %v281_v48 }
 0x11e   : > { %609 = vmatmul.msk.f32.gmra.mxu1 %vm282_vm1, %v261_v49 }
 0x153   : > { %v402_v50 = vpop.f32.mrf.mxu1  ;;  %v396_v63 = vpop.f32.mrf.mxu0 }
 0x154   : > { %495 = vst.msk [vmem:[%s852_s16 + $0x10] sm:$0xff] %vm492_vm2, %v402_v50 }
 0x155   : > { %493 = vst.msk [vmem:[%s852_s16] sm:$0xff] %vm492_vm2, %v396_v63 }
 0x158   : > { %v432_v51 = vpop.f32.mrf.mxu2  ;;  %v462_v52 = vpop.f32.mrf.mxu3 }
 0x159   : > { %505 = vst.msk [vmem:[%s852_s16 + $0x60] sm:$0xff] %vm492_vm2, %v432_v51 }
 0x15a   : > { %515 = vst.msk [vmem:[%s852_s16 + $0xb0] sm:$0xff] %vm492_vm2, %v462_v52 }
 0x15b   : > { %v405_v53 = vpop.f32.mrf.mxu1  ;;  %v399_v3 = vpop.f32.mrf.mxu0 }
 0x15c   : > { %496 = vst.msk [vmem:[%s852_s16 + $0x18] sm:$0xff] %vm492_vm2, %v405_v53 }
 0x15d   : > { %494 = vst.msk [vmem:[%s852_s16 + $0x8] sm:$0xff] %vm492_vm2, %v399_v3 }
 0x160   : > { %v435_v54 = vpop.f32.mrf.mxu2  ;;  %v465_v55 = vpop.f32.mrf.mxu3 }
 0x161   : > { %506 = vst.msk [vmem:[%s852_s16 + $0x68] sm:$0xff] %vm492_vm2, %v435_v54 }
 0x162   : > { %516 = vst.msk [vmem:[%s852_s16 + $0xb8] sm:$0xff] %vm492_vm2, %v465_v55 }
 0x163   : > { %v408_v56 = vpop.f32.mrf.mxu1 }
 0x164   : > { %497 = vst.msk [vmem:[%s852_s16 + $0x20] sm:$0xff] %vm492_vm2, %v408_v56 }
 0x168   : > { %v438_v57 = vpop.f32.mrf.mxu2  ;;  %v468_v58 = vpop.f32.mrf.mxu3 }
 0x169   : > { %507 = vst.msk [vmem:[%s852_s16 + $0x70] sm:$0xff] %vm492_vm2, %v438_v57 }
 0x16a   : > { %517 = vst.msk [vmem:[%s852_s16 + $0xc0] sm:$0xff] %vm492_vm2, %v468_v58 }
 0x16b   : > { %v411_v59 = vpop.f32.mrf.mxu1 }
 0x16c   : > { %498 = vst.msk [vmem:[%s852_s16 + $0x28] sm:$0xff] %vm492_vm2, %v411_v59 }
 0x170   : > { %v441_v60 = vpop.f32.mrf.mxu2  ;;  %v471_v61 = vpop.f32.mrf.mxu3 }
 0x171   : > { %508 = vst.msk [vmem:[%s852_s16 + $0x78] sm:$0xff] %vm492_vm2, %v441_v60 }
 0x172   : > { %518 = vst.msk [vmem:[%s852_s16 + $0xc8] sm:$0xff] %vm492_vm2, %v471_v61 }
 0x173   : > { %v414_v62 = vpop.f32.mrf.mxu1 }
 0x174   : > { %499 = vst.msk [vmem:[%s852_s16 + $0x30] sm:$0xff] %vm492_vm2, %v414_v62 }
 0x178   : > { %v444_v0 = vpop.f32.mrf.mxu2  ;;  %v474_v1 = vpop.f32.mrf.mxu3 }
 0x179   : > { %509 = vst.msk [vmem:[%s852_s16 + $0x80] sm:$0xff] %vm492_vm2, %v444_v0 }
 0x17a   : > { %519 = vst.msk [vmem:[%s852_s16 + $0xd0] sm:$0xff] %vm492_vm2, %v474_v1 }
 0x17b   : > { %v417_v2 = vpop.f32.mrf.mxu1 }
 0x17c   : > { %500 = vst.msk [vmem:[%s852_s16 + $0x38] sm:$0xff] %vm492_vm2, %v417_v2 }
 0x180   : > { %v447_v4 = vpop.f32.mrf.mxu2  ;;  %v477_v5 = vpop.f32.mrf.mxu3 }
 0x181   : > { %510 = vst.msk [vmem:[%s852_s16 + $0x88] sm:$0xff] %vm492_vm2, %v447_v4 }
 0x182   : > { %520 = vst.msk [vmem:[%s852_s16 + $0xd8] sm:$0xff] %vm492_vm2, %v477_v5 }
 0x183   : > { %v420_v6 = vpop.f32.mrf.mxu1 }
 0x184   : > { %501 = vst.msk [vmem:[%s852_s16 + $0x40] sm:$0xff] %vm492_vm2, %v420_v6 }
 0x188   : > { %v450_v7 = vpop.f32.mrf.mxu2  ;;  %v480_v8 = vpop.f32.mrf.mxu3 }
 0x189   : > { %511 = vst.msk [vmem:[%s852_s16 + $0x90] sm:$0xff] %vm492_vm2, %v450_v7 }
 0x18a   : > { %521 = vst.msk [vmem:[%s852_s16 + $0xe0] sm:$0xff] %vm492_vm2, %v480_v8 }
 0x18b   : > { %v423_v9 = vpop.f32.mrf.mxu1 }
 0x18c   : > { %502 = vst.msk [vmem:[%s852_s16 + $0x48] sm:$0xff] %vm492_vm2, %v423_v9 }
 0x190   : > { %v453_v10 = vpop.f32.mrf.mxu2  ;;  %v483_v11 = vpop.f32.mrf.mxu3 }
 0x191   : > { %512 = vst.msk [vmem:[%s852_s16 + $0x98] sm:$0xff] %vm492_vm2, %v453_v10 }
 0x192   : > { %522 = vst.msk [vmem:[%s852_s16 + $0xe8] sm:$0xff] %vm492_vm2, %v483_v11 }
 0x193   : > { %v426_v12 = vpop.f32.mrf.mxu1 }
 0x194   : > { %503 = vst.msk [vmem:[%s852_s16 + $0x50] sm:$0xff] %vm492_vm2, %v426_v12 }
 0x198   : > { %v456_v13 = vpop.f32.mrf.mxu2  ;;  %v486_v14 = vpop.f32.mrf.mxu3 }
 0x199   : > { %513 = vst.msk [vmem:[%s852_s16 + $0xa0] sm:$0xff] %vm492_vm2, %v456_v13 }
 0x19a   : > { %523 = vst.msk [vmem:[%s852_s16 + $0xf0] sm:$0xff] %vm492_vm2, %v486_v14 }
 0x19b   : > { %v429_v15 = vpop.f32.mrf.mxu1 }
 0x19c   : > { %504 = vst.msk [vmem:[%s852_s16 + $0x58] sm:$0xff] %vm492_vm2, %v429_v15 }
 0x1a0   : > { %v459_v16 = vpop.f32.mrf.mxu2  ;;  %v489_v17 = vpop.f32.mrf.mxu3 }
 0x1a1   : > { %514 = vst.msk [vmem:[%s852_s16 + $0xa8] sm:$0xff] %vm492_vm2, %v459_v16 }
 0x1a2   : > { %524 = vst.msk [vmem:[%s852_s16 + $0xf8] sm:$0xff] %vm492_vm2, %v489_v17 }
 0x1a3 PF: > { %s13_s12 = sadd.s32 1, %s670_s12  }
 0x1a4   : > { %p10_p5 = scmp.ge.s32.totalorder %s13_s12, 4  }
 0x1a6   :  { %12 = sbr.rel (!%p10_p5) target bundleno = 1 (0x1), region = 62 }

</bundles_post_ra>
